<compile_context>
chip_gen: v7x
topology: tpu7x:2x2x1
jax: 0.10.0
libtpu: 0.0.40
codegen_flags: <defaults>
</compile_context>

<pallas_src>
import functools

import jax
import jax.numpy as jnp
from jax.experimental import pallas as pl
from jax.experimental.pallas import tpu as pltpu


def _round_up(a, b):
    return ((a + b - 1) // b) * b


def _edgeconv_kernel(xg_ref, w_ref, b_ref, o_ref, *, k):
    # xg_ref: (1, k, 2C, tile)  w_ref: (C_out, 2C)  b_ref: (C_out, 1)  o_ref: (1, C_out, tile)
    w = w_ref[...]
    acc = None
    for s in range(k):  # k is small & static -> unrolled; running max keeps liveness low
        h = jnp.dot(w, xg_ref[0, s], preferred_element_type=jnp.float32)  # (C_out, tile)
        acc = h if acc is None else jnp.maximum(acc, h)
    # bias + ReLU hoisted out of the k loop (ReLU monotonic, bias constant over k)
    acc = jnp.maximum(acc + b_ref[...], 0.0)
    o_ref[0, :, :] = acc.astype(o_ref.dtype)


def edge_conv2d_pallas(x, edge_index, weight, bias, *,
                       tile_n=1024, stream_dtype=None,
                       vmem_budget_bytes=None, vmem_limit_bytes=None):
    """x: (B, C, N, 1), edge_index: (2, B, N, k) int32,
    weight: (C_out, 2C, 1, 1), bias: (C_out,). Returns (B, C_out, N, 1) float32."""
    B, C, N, _ = x.shape
    k = int(edge_index.shape[-1])
    C_out = weight.shape[0]
    C2 = 2 * C

    # ---- weights: fold the (x_j - x_i) subtraction and stack into one matrix ----
    w = weight.reshape(C_out, C2).astype(jnp.float32)
    w1 = w[:, :C]
    w2 = w[:, C:]
    # h = W1 x_i + W2 (x_j - x_i) == (W1 - W2) x_i + W2 x_j == W_stack @ [x_i ; x_j]
    w_stack = jnp.concatenate([w1 - w2, w2], axis=1)        # (C_out, 2C)
    b_col = bias.astype(jnp.float32).reshape(C_out, 1)

    # ---- single gather into channel-on-sublane layout (B, k, 2C, N) -------------
    x_sq = x[..., 0].astype(jnp.float32)                     # (B, C, N) (already N-on-lanes)
    idx_i = jnp.transpose(edge_index[1], (0, 2, 1))          # (B, k, N) centers
    idx_j = jnp.transpose(edge_index[0], (0, 2, 1))          # (B, k, N) neighbors
    idx2 = jnp.stack([idx_i, idx_j], axis=2).reshape(B, 2 * k, N)   # (B, 2k, N)

    def _gather_one(xb, idx_b):                               # (C, N), (2k, N) -> (2k, C, N)
        return jax.vmap(lambda iv: xb[:, iv])(idx_b)

    xg = jax.vmap(_gather_one)(x_sq, idx2)                    # (B, 2k, C, N)
    xg = xg.reshape(B, k, C2, N)                              # free reshape: [x_i ; x_j] per slot

    if stream_dtype is not None:                              # e.g. bf16 on v6e/v7x
        xg = xg.astype(stream_dtype)
        w_stack = w_stack.astype(stream_dtype)

    # ---- per-generation VMEM budgets ---------------------------------------------
    try:
        vmem_cap = int(pltpu.get_tpu_info().vmem_capacity_bytes)
    except Exception:
        vmem_cap = 64 * 1024 * 1024                           # conservative fallback
    small_vmem = vmem_cap <= 64 * 1024 * 1024                 # v7x-class (64 MiB / TC)
    if vmem_budget_bytes is None:
        vmem_budget_bytes = (40 if small_vmem else 72) * 1024 * 1024
    if vmem_limit_bytes is None:
        vmem_limit_bytes = (48 if small_vmem else 96) * 1024 * 1024

    # ---- tile selection with real on-chip footprint accounting --------------------
    itemsize = jnp.dtype(xg.dtype).itemsize
    sub = 8 if itemsize >= 4 else (16 if itemsize == 2 else 32)   # sublane packing granule

    def step_bytes(t):                                        # t is a multiple of 128 (lane-dense)
        inp = 2 * k * _round_up(C2, sub) * t * itemsize       # double-buffered input block
        outp = 2 * _round_up(C_out, 8) * t * 4                # double-buffered f32 output block
        wgt = 2 * _round_up(C_out, sub) * _round_up(C2, 128) * itemsize \
            + _round_up(C_out, 8) * 128 * 4                   # weights + bias
        scratch = 2 * _round_up(C_out, 8) * t * 4             # acc + h f32 intermediates
        return inp + outp + wgt + scratch

    tile = min(int(tile_n), _round_up(N, 128))
    tile = max(128, (tile // 128) * 128)
    while tile > 256 and step_bytes(tile) > vmem_budget_bytes:
        tile = max(256, ((tile // 2) // 128) * 128)

    N_pad = _round_up(N, tile)
    if N_pad != N:                                            # pad, slice later (no remainder path)
        xg = jnp.pad(xg, ((0, 0), (0, 0), (0, 0), (0, N_pad - N)))

    grid = (B, N_pad // tile)
    kernel = functools.partial(_edgeconv_kernel, k=k)

    out = pl.pallas_call(
        kernel,
        out_shape=jax.ShapeDtypeStruct((B, C_out, N_pad), jnp.float32),
        grid=grid,
        in_specs=[
            pl.BlockSpec((1, k, C2, tile), lambda b, i: (b, 0, 0, i)),
            pl.BlockSpec((C_out, C2), lambda b, i: (0, 0)),
            pl.BlockSpec((C_out, 1), lambda b, i: (0, 0)),
        ],
        out_specs=pl.BlockSpec((1, C_out, tile), lambda b, i: (b, 0, i)),
        compiler_params=pltpu.CompilerParams(
            dimension_semantics=("parallel", "parallel"),
            vmem_limit_bytes=vmem_limit_bytes,
        ),
    )(xg, w_stack, b_col)

    out = out[:, :, :N]                                       # drop N padding; already (B, C_out, N)
    return out[..., None]                                     # NCHW: (B, C_out, N, 1)


def edge_conv2d_reference(x, edge_index, weight, bias):
    """Pure-JAX reference mirroring the PyTorch forward exactly."""
    x_sq = x[..., 0]                                          # (B, C, N)
    gather = jax.vmap(lambda xb, ib: xb[:, ib])               # (B,C,N),(B,N,k)->(B,C,N,k)
    x_i = gather(x_sq, edge_index[1])
    x_j = gather(x_sq, edge_index[0])
    feat = jnp.concatenate([x_i, x_j - x_i], axis=1)          # (B, 2C, N, k)
    w = weight.reshape(weight.shape[0], -1)                   # (C_out, 2C)
    out = jnp.einsum('oc,bcnk->bonk', w, feat) + bias[None, :, None, None]
    out = jnp.maximum(out, 0.0)
    return jnp.max(out, axis=-1, keepdims=True)               # (B, C_out, N, 1)


def _make_inputs(key, B, C, N, K, C_OUT):
    kx, kidx0, kidx1, kw, kb = jax.random.split(key, 5)
    x = jax.random.normal(kx, (B, C, N, 1), dtype=jnp.float32)
    edge_index = jnp.stack([
        jax.random.randint(kidx0, (B, N, K), 0, N, dtype=jnp.int32),   # neighbors
        jax.random.randint(kidx1, (B, N, K), 0, N, dtype=jnp.int32),   # centers
    ], axis=0)
    fan_in = 2 * C
    weight = jax.random.normal(kw, (C_OUT, 2 * C, 1, 1), dtype=jnp.float32) / jnp.sqrt(fan_in)
    bias = jax.random.normal(kb, (C_OUT,), dtype=jnp.float32) * 0.1
    return x, edge_index, weight, bias


if __name__ == "__main__":
    key = jax.random.PRNGKey(0)
    k1, k2 = jax.random.split(key)

    # Primary small case matching the module's expected layout.
    B, C, N, K, C_OUT = 2, 4, 16, 8, 8
    x, edge_index, weight, bias = _make_inputs(k1, B, C, N, K, C_OUT)
    out = jax.block_until_ready(edge_conv2d_pallas(x, edge_index, weight, bias))
    ref = edge_conv2d_reference(x, edge_index, weight, bias)
    assert out.shape == (B, C_OUT, N, 1), out.shape
    assert jnp.allclose(out, ref, rtol=1e-5, atol=1e-5), "mismatch vs reference (case 1)"

    # Second case exercising the N-padding path and non-multiple-of-8 C_out.
    B2, C2, N2, K2, C_OUT2 = 2, 6, 20, 4, 10
    x2, ei2, w2_, b2_ = _make_inputs(k2, B2, C2, N2, K2, C_OUT2)
    out2 = jax.block_until_ready(edge_conv2d_pallas(x2, ei2, w2_, b2_))
    ref2 = edge_conv2d_reference(x2, ei2, w2_, b2_)
    assert out2.shape == (B2, C_OUT2, N2, 1), out2.shape
    assert jnp.allclose(out2, ref2, rtol=1e-5, atol=1e-5), "mismatch vs reference (case 2)"

    # Third run exercising the bf16-streaming path (loose tolerance vs f32 reference).
    out3 = jax.block_until_ready(
        edge_conv2d_pallas(x, edge_index, weight, bias, stream_dtype=jnp.bfloat16))
    assert out3.shape == (B, C_OUT, N, 1), out3.shape
    assert jnp.allclose(out3, ref, rtol=5e-2, atol=5e-2), "mismatch vs reference (bf16 case)"

    print("KERNEL_OK")
</pallas_src>

<mosaic_0001>
module attributes {stable_mosaic.version = 11 : i64} {
  func.func @_edgeconv_kernel(%arg0: i32, %arg1: i32, %arg2: memref<1x8x8x128xf32, #tpu.memory_space<vmem>>, %arg3: memref<8x8xf32, #tpu.memory_space<vmem>>, %arg4: memref<8x1xf32, #tpu.memory_space<vmem>>, %arg5: memref<1x8x128xf32, #tpu.memory_space<vmem>>) attributes {dimension_semantics = [#tpu.dimension_semantics<parallel>, #tpu.dimension_semantics<parallel>], iteration_bounds = array<i64: 2, 1>, scalar_prefetch = 0 : i64, scratch_operands = 0 : i64, tpu.core_type = #tpu.core_type<tc>, window_params = [{transform_indices = @transform_0, window_bounds = array<i64: 1, 8, 8, 128>}, {pipeline_mode = #tpu.pipeline_mode<synchronous>, transform_indices = @transform_1, window_bounds = array<i64: 8, 8>}, {pipeline_mode = #tpu.pipeline_mode<synchronous>, transform_indices = @transform_2, window_bounds = array<i64: 8, 1>}, {transform_indices = @transform_3, window_bounds = array<i64: 1, 8, 128>}]} {
    %c0 = arith.constant 0 : index
    %c0_0 = arith.constant 0 : index
    %0 = vector.load %arg3[%c0, %c0_0] : memref<8x8xf32, #tpu.memory_space<vmem>>, vector<8x8xf32>
    %c0_1 = arith.constant 0 : index
    %c0_2 = arith.constant 0 : index
    %c0_3 = arith.constant 0 : index
    %c0_4 = arith.constant 0 : index
    %1 = vector.load %arg2[%c0_1, %c0_2, %c0_3, %c0_4] : memref<1x8x8x128xf32, #tpu.memory_space<vmem>>, vector<1x1x8x128xf32>
    %2 = vector.shape_cast %1 : vector<1x1x8x128xf32> to vector<8x128xf32>
    %cst = arith.constant dense<0.000000e+00> : vector<8x128xf32>
    %3 = tpu.matmul %0, %2, %cst {dimension_numbers = #tpu.dot_dimension_numbers<[1], [0], [0], [1], [0, 0, 1, 1], [], []>} : vector<8x8xf32>, vector<8x128xf32>, vector<8x128xf32> -> vector<8x128xf32>
    %c0_5 = arith.constant 0 : index
    %c1 = arith.constant 1 : index
    %c0_6 = arith.constant 0 : index
    %c0_7 = arith.constant 0 : index
    %4 = vector.load %arg2[%c0_5, %c1, %c0_6, %c0_7] : memref<1x8x8x128xf32, #tpu.memory_space<vmem>>, vector<1x1x8x128xf32>
    %5 = vector.shape_cast %4 : vector<1x1x8x128xf32> to vector<8x128xf32>
    %cst_8 = arith.constant dense<0.000000e+00> : vector<8x128xf32>
    %6 = tpu.matmul %0, %5, %cst_8 {dimension_numbers = #tpu.dot_dimension_numbers<[1], [0], [0], [1], [0, 0, 1, 1], [], []>} : vector<8x8xf32>, vector<8x128xf32>, vector<8x128xf32> -> vector<8x128xf32>
    %7 = arith.maximumf %3, %6 : vector<8x128xf32>
    %c0_9 = arith.constant 0 : index
    %c2 = arith.constant 2 : index
    %c0_10 = arith.constant 0 : index
    %c0_11 = arith.constant 0 : index
    %8 = vector.load %arg2[%c0_9, %c2, %c0_10, %c0_11] : memref<1x8x8x128xf32, #tpu.memory_space<vmem>>, vector<1x1x8x128xf32>
    %9 = vector.shape_cast %8 : vector<1x1x8x128xf32> to vector<8x128xf32>
    %cst_12 = arith.constant dense<0.000000e+00> : vector<8x128xf32>
    %10 = tpu.matmul %0, %9, %cst_12 {dimension_numbers = #tpu.dot_dimension_numbers<[1], [0], [0], [1], [0, 0, 1, 1], [], []>} : vector<8x8xf32>, vector<8x128xf32>, vector<8x128xf32> -> vector<8x128xf32>
    %11 = arith.maximumf %7, %10 : vector<8x128xf32>
    %c0_13 = arith.constant 0 : index
    %c3 = arith.constant 3 : index
    %c0_14 = arith.constant 0 : index
    %c0_15 = arith.constant 0 : index
    %12 = vector.load %arg2[%c0_13, %c3, %c0_14, %c0_15] : memref<1x8x8x128xf32, #tpu.memory_space<vmem>>, vector<1x1x8x128xf32>
    %13 = vector.shape_cast %12 : vector<1x1x8x128xf32> to vector<8x128xf32>
    %cst_16 = arith.constant dense<0.000000e+00> : vector<8x128xf32>
    %14 = tpu.matmul %0, %13, %cst_16 {dimension_numbers = #tpu.dot_dimension_numbers<[1], [0], [0], [1], [0, 0, 1, 1], [], []>} : vector<8x8xf32>, vector<8x128xf32>, vector<8x128xf32> -> vector<8x128xf32>
    %15 = arith.maximumf %11, %14 : vector<8x128xf32>
    %c0_17 = arith.constant 0 : index
    %c4 = arith.constant 4 : index
    %c0_18 = arith.constant 0 : index
    %c0_19 = arith.constant 0 : index
    %16 = vector.load %arg2[%c0_17, %c4, %c0_18, %c0_19] : memref<1x8x8x128xf32, #tpu.memory_space<vmem>>, vector<1x1x8x128xf32>
    %17 = vector.shape_cast %16 : vector<1x1x8x128xf32> to vector<8x128xf32>
    %cst_20 = arith.constant dense<0.000000e+00> : vector<8x128xf32>
    %18 = tpu.matmul %0, %17, %cst_20 {dimension_numbers = #tpu.dot_dimension_numbers<[1], [0], [0], [1], [0, 0, 1, 1], [], []>} : vector<8x8xf32>, vector<8x128xf32>, vector<8x128xf32> -> vector<8x128xf32>
    %19 = arith.maximumf %15, %18 : vector<8x128xf32>
    %c0_21 = arith.constant 0 : index
    %c5 = arith.constant 5 : index
    %c0_22 = arith.constant 0 : index
    %c0_23 = arith.constant 0 : index
    %20 = vector.load %arg2[%c0_21, %c5, %c0_22, %c0_23] : memref<1x8x8x128xf32, #tpu.memory_space<vmem>>, vector<1x1x8x128xf32>
    %21 = vector.shape_cast %20 : vector<1x1x8x128xf32> to vector<8x128xf32>
    %cst_24 = arith.constant dense<0.000000e+00> : vector<8x128xf32>
    %22 = tpu.matmul %0, %21, %cst_24 {dimension_numbers = #tpu.dot_dimension_numbers<[1], [0], [0], [1], [0, 0, 1, 1], [], []>} : vector<8x8xf32>, vector<8x128xf32>, vector<8x128xf32> -> vector<8x128xf32>
    %23 = arith.maximumf %19, %22 : vector<8x128xf32>
    %c0_25 = arith.constant 0 : index
    %c6 = arith.constant 6 : index
    %c0_26 = arith.constant 0 : index
    %c0_27 = arith.constant 0 : index
    %24 = vector.load %arg2[%c0_25, %c6, %c0_26, %c0_27] : memref<1x8x8x128xf32, #tpu.memory_space<vmem>>, vector<1x1x8x128xf32>
    %25 = vector.shape_cast %24 : vector<1x1x8x128xf32> to vector<8x128xf32>
    %cst_28 = arith.constant dense<0.000000e+00> : vector<8x128xf32>
    %26 = tpu.matmul %0, %25, %cst_28 {dimension_numbers = #tpu.dot_dimension_numbers<[1], [0], [0], [1], [0, 0, 1, 1], [], []>} : vector<8x8xf32>, vector<8x128xf32>, vector<8x128xf32> -> vector<8x128xf32>
    %27 = arith.maximumf %23, %26 : vector<8x128xf32>
    %c0_29 = arith.constant 0 : index
    %c7 = arith.constant 7 : index
    %c0_30 = arith.constant 0 : index
    %c0_31 = arith.constant 0 : index
    %28 = vector.load %arg2[%c0_29, %c7, %c0_30, %c0_31] : memref<1x8x8x128xf32, #tpu.memory_space<vmem>>, vector<1x1x8x128xf32>
    %29 = vector.shape_cast %28 : vector<1x1x8x128xf32> to vector<8x128xf32>
    %cst_32 = arith.constant dense<0.000000e+00> : vector<8x128xf32>
    %30 = tpu.matmul %0, %29, %cst_32 {dimension_numbers = #tpu.dot_dimension_numbers<[1], [0], [0], [1], [0, 0, 1, 1], [], []>} : vector<8x8xf32>, vector<8x128xf32>, vector<8x128xf32> -> vector<8x128xf32>
    %31 = arith.maximumf %27, %30 : vector<8x128xf32>
    %c0_33 = arith.constant 0 : index
    %c0_34 = arith.constant 0 : index
    %32 = vector.load %arg4[%c0_33, %c0_34] : memref<8x1xf32, #tpu.memory_space<vmem>>, vector<8x1xf32>
    %33 = vector.broadcast %32 : vector<8x1xf32> to vector<8x128xf32>
    %34 = arith.addf %31, %33 : vector<8x128xf32>
    %cst_35 = arith.constant 0.000000e+00 : f32
    %35 = vector.broadcast %cst_35 : f32 to vector<8x128xf32>
    %36 = arith.maximumf %34, %35 : vector<8x128xf32>
    %c0_36 = arith.constant 0 : index
    %c0_37 = arith.constant 0 : index
    %c0_38 = arith.constant 0 : index
    %37 = vector.load %arg5[%c0_36, %c0_37, %c0_38] : memref<1x8x128xf32, #tpu.memory_space<vmem>>, vector<1x8x128xf32>
    %38 = vector.shape_cast %37 : vector<1x8x128xf32> to vector<8x128xf32>
    %39 = vector.shape_cast %36 : vector<8x128xf32> to vector<1x8x128xf32>
    tpu.vector_store %arg5[%c0_36, %c0_37, %c0_38], %39 {strides = array<i32>} : memref<1x8x128xf32, #tpu.memory_space<vmem>>, vector<1x8x128xf32>,
    return
  }
  func.func @transform_0(%arg0: i32, %arg1: i32) -> (i32, i32, i32, i32) {
    %c0_i32 = arith.constant 0 : i32
    %c0_i32_0 = arith.constant 0 : i32
    %c0_i32_1 = arith.constant 0 : i32
    return %arg0, %c0_i32, %c0_i32_0, %arg1 : i32, i32, i32, i32
  }
  func.func @transform_1(%arg0: i32, %arg1: i32) -> (i32, i32) {
    %c0_i32 = arith.constant 0 : i32
    %c0_i32_0 = arith.constant 0 : i32
    %c0_i32_1 = arith.constant 0 : i32
    return %c0_i32, %c0_i32_0 : i32, i32
  }
  func.func @transform_2(%arg0: i32, %arg1: i32) -> (i32, i32) {
    %c0_i32 = arith.constant 0 : i32
    %c0_i32_0 = arith.constant 0 : i32
    %c0_i32_1 = arith.constant 0 : i32
    return %c0_i32, %c0_i32_0 : i32, i32
  }
  func.func @transform_3(%arg0: i32, %arg1: i32) -> (i32, i32, i32) {
    %c0_i32 = arith.constant 0 : i32
    %c0_i32_0 = arith.constant 0 : i32
    return %arg0, %c0_i32, %arg1 : i32, i32, i32
  }
}

</mosaic_0001>

<bundles_post_ra>
// kernel: tpu_custom_call.1
= control target key start
LH: loop header
LB: loop body
LE: loop exit
PB: predicated region body
PF: predicated region fallthrough
CT: control target
= control target key end

     0   :  { %8 = vsyncpa [#allocation3], 0  ;;  %s1399_s0 = inlined_call_operand.hbm [shape: f32[2,8,8,128], index: 0, kind: input, shape index: {}]   ;;  %s1400_s1 = inlined_call_operand.vmem [shape: f32[8,8], index: 1, kind: input, shape index: {}]   ;;  %s1401_s2 = inlined_call_operand.vmem [shape: f32[8,1], index: 2, kind: input, shape index: {}]   ;;  %s1402_s3 = inlined_call_operand.hbm [shape: f32[2,8,128], index: 3, kind: output, shape index: {}]  }
   0x1   :  { %10 = vsyncpa [#allocation3 + $0x1], 0 }
   0x2   :  { %11 = vsyncpa [#allocation4], 0 }
   0x3   :  { %13 = vsyncpa [#allocation4 + $0x1], 0  ;;  %s1193_s12 = smov 0   ;;  %s1195_s13 = smov 0  }
   0x4   :  { %s1197_s14 = smov 0   ;;  %s1199_s15 = smov 0  }
   0x5   :  { %s1201_s16 = smov 0   ;;  %s1203_s17 = smov 0  }
   0x6 LB: > { %s898_s18 = sadd.s32 4294967295, %s1164_s17   ;;  %s899_s19 = sadd.s32 4294967294, %s1164_s17   ;;  %s1164_s17 = sphi %s1203_s17, %s19_s17   ;;  %s1160_s16 = sphi %s1201_s16, %s1417_s16   ;;  %s1156_s15 = sphi %s1199_s15, %s1416_s15   ;;  %s1152_s14 = sphi %s1197_s14, %s1415_s14   ;;  %s1148_s13 = sphi %s1195_s13, %s1414_s13   ;;  %s1144_s12 = sphi %s1193_s12, %s1413_s12  }
   0x7   : > { %s31_s20 = sadd.s32 1, %s1160_s16  ;;  %s40_s21 = sadd.s32 1, %s1152_s14 }
   0x8   : > { %p33_p0 = scmp.ge.s32.totalorder %s31_s20, 2  ;;  %p47_p1 = scmp.ne.s32.totalorder %s1152_s14, %s1148_s13 }
   0x9   : > { %p48_p2 = scmp.eq.s32.totalorder %s1164_s17, 0  ;;  %p53_p3 = scmp.ne.s32.totalorder %s1148_s13, %s1144_s12 }
   0xa   : > { %s1419_s20 = smov (%p33_p0, %s31_s20), 0  ;;  %p54_p5 = scmp.eq.s32.totalorder %s898_s18, 0 }
   0xb   : > { %p1234_p4 = por %p48_p2, %p47_p1  ;;  %s35_s23 = ssub.s32 %s1160_s16, %s1419_s20 }
   0xc   : > { %p121_p6 = scmp.eq.s32.totalorder %s898_s18, 1  ;;  %p38_p7 = scmp.eq.s32.totalorder %s35_s23, 0 }
   0xd   : > { %p1240_p8 = por %p54_p5, %p53_p3  ;;  %p127_p10 = scmp.eq.s32.totalorder %s899_s19, 1 }
   0xe   : > { %p1244_p9 = por %p121_p6, %p47_p1  ;;  %p996_p13 = scmp.lt.s32.totalorder %s1164_s17, 2 }
   0xf   : > { %s1249_s26 = scalar_select %p38_p7, %s1152_s14, %s40_s21  }
  0x10   : > { %s1406_s25 = scalar_select %p1244_p9, 1, 0 }
  0x11   : > { %p1251_p11 = por %p127_p10, %p53_p3  ;;  %s153_s28 = sand.u32 1, %s1152_s14  }
  0x12   : > { %s902_s29 = sshll.u32 %s153_s28, 6  ;;  %s927_s30 = sshll.u32 %s1160_s16, 10 }
  0x13   : > { %s1407_s27 = scalar_select %p1251_p11, 1, 0 }
  0x14   : > { %s1262_s6 = scalar_lea.hbm %s1399_s0, %s927_s30  ;;  %s157_s7 = scalar_lea.vmem [#allocation2], %s902_s29 }
  0x15   : > { %s165_s8 = sshll.u32 %s157_s7, 4  ;;  %p1268_p0 = pnand %p996_p13, %p1234_p4  ;;  %s1264_s8 = int_to_ptr.vmem [resolvable:$true] %s165_s8 }
  0x16   : > { %s1273_s10 = scalar_lea.sflag [#allocation3], %s153_s28  ;;  %s1052_s11 = scalar_lea.hbm %s1262_s6, 1024 }
  0x17   : > { %p1053_p2 = scmp.ne.s32.totalorder %s1262_s6, %s1052_s11  ;;  %p1054_p3 = pneg %p1268_p0 }
  0x18   : > { %s1057_s21 = scalar_lea.hbm %s1399_s0, 2048  ;;  %p1058_p4 = scmp.lt.u32.totalorder %s1262_s6, %s1399_s0 }
  0x19   : > { %p1055_p5 = pnand %p1054_p3, %p1053_p2  ;;  %p1059_p7 = scmp.lt.u32.totalorder %s1057_s21, %s1052_s11 }
  0x1a   : > { %p1061_p13 = scmp.lt.u32.totalorder %s1052_s11, %s1262_s6 }
  0x1b   : > { %p1056_p6 = pneg %p1055_p5  ;;  %p1060_p10 = por %p1059_p7, %p1058_p4 }
  0x1d   : > { %p1062_p12 = por %p1061_p13, %p1060_p10 }
  0x1f   : > { %p1063_p1 = pnand %p1062_p12, %p1056_p6 }
  0x21   : > { %1066 = shalt.err (!%p1063_p1)
}
  0x22   : > { %s1067_s28 = scalar_lea.vmem %s1264_s8, 1024  ;;  %s1166_s29 = smov [#allocation2]  }
  0x23   : > { %p1068_p2 = scmp.ne.s32.totalorder %s1264_s8, %s1067_s28  ;;  %s1072_s30 = sshll.u32 %s1166_s29, 4  ;;  %s1073_s30 = int_to_ptr.vmem [resolvable:$false] %s1072_s30 }
  0x24   : > { %s1074_s4 = scalar_lea.vmem %s1073_s30, 2048  ;;  %p1075_p9 = scmp.lt.s32.totalorder %s1264_s8, %s1073_s30 }
  0x25   : > { %p1070_p5 = pnand %p1068_p2, %p1054_p3  ;;  %p1076_p4 = scmp.lt.s32.totalorder %s1074_s4, %s1067_s28 }
  0x27   : > { %p1071_p11 = pneg %p1070_p5  ;;  %p1077_p7 = por %p1076_p4, %p1075_p9 }
  0x29   : > { %p1078_p10 = pnand %p1077_p7, %p1071_p11 }
  0x2b   : > { %1081 = shalt.err (!%p1078_p10)
}
  0x2c   : > { %s1167_s5 = smov 128   ;;  %s1168_s7 = smov 8  }
  0x2d   : > { %991 = dma.hbm_to_vmem [thread:$0]  (!%p1268_p0), %s1262_s6, 1024, %s1264_s8, %s1273_s10, %s1167_s5, %s1167_s5, %s1168_s7  }
  0x2e   : > { %p173_p12 = scmp.lt.s32.totalorder %s1164_s17, 3  ;;  %p1409_p1 = scmp.ge.s32.totalorder %s1164_s17, 1 }
  0x30   : > { %p174_p3 = pnand %p1409_p1, %p173_p12 }
  0x31   : > { %s1305_s11 = sand.u32 (!%p174_p3), 1, %s1148_s13  }
  0x32   : > { %177 = sbr.rel (%p174_p3) target bundleno = 308 (0x134), region = 32  ;;  %s906_s18 = sshll.u32 (!%p174_p3), %s1305_s11, 6 }
  0x33   : > { %s180_s19 = scalar_lea.sflag (!%p174_p3), [#allocation3], %s1305_s11  ;;  %s1309_s21 = scalar_lea.vmem (!%p174_p3), [#allocation2], %s906_s18 }
  0x39   : > { %1135 = dma.done.wait (%p1240_p8), %s180_s19, 1024  }
  0x3a   : > { %1137 = vsyncadd (%p1240_p8), %s180_s19, 4294966272  ;;  %v1169_v0 = vmov 0.0   ;;  %vm1170_vm0 = vmmov 0   ;;  %v1171_v1 = vmov 0   ;;  %vm208_vm1 = vcmask 64512   ;;  %v207_v2 = vld [vmem:[%s1309_s21] sm:$0xff] }
  0x3b   : > { %944 = vmatprep.subr.mxu0 %v1169_v0  ;;  %946 = vmatprep.mubr.msk.f32.mxu0 %vm1170_vm0, %v1169_v0  ;;  %v206_v3 = vld [vmem:[%s1400_s1] sm:$0xff]  ;;  %v909_v4 = vld [vmem:[%s1309_s21 + $0x8] sm:$0xff]  ;;  %v911_v5 = vld [vmem:[%s1309_s21 + $0x10] sm:$0xff]  ;;  %s907_s10 = sshll.u32 %s1305_s11, 3  ;;  %s924_s22 = sshll.u32 %s1156_s15, 7 }
  0x3c   : > { %949 = vmatprep.subr.mxu1 %v1169_v0  ;;  %951 = vmatprep.mubr.msk.f32.mxu1 %vm1170_vm0, %v1169_v0  ;;  %v913_v6 = vld [vmem:[%s1309_s21 + $0x18] sm:$0xff]  ;;  %v915_v7 = vld [vmem:[%s1309_s21 + $0x20] sm:$0xff]  ;;  %v917_v8 = vld [vmem:[%s1309_s21 + $0x28] sm:$0xff]  ;;  %s205_s23 = scalar_lea.vmem [#allocation5], %s907_s10  ;;  %s1350_s4 = scalar_lea.hbm %s1402_s3, %s924_s22 }
  0x3d   : > { %1051 = vset.pattern.permute.xlu0 %v1171_v1  ;;  %945 = vmatpush3.msra.mxu0 %v207_v2  ;;  %v919_v9 = vld [vmem:[%s1309_s21 + $0x30] sm:$0xff]  ;;  %v921_v10 = vld [vmem:[%s1309_s21 + $0x38] sm:$0xff]  ;;  %v793_v11 = vld [vmem:[%s1401_s2] sm:$0xff]  ;;  %s817_s28 = sshll.u32 %s205_s23, 4  ;;  %s803_s5 = scalar_lea.sflag [#allocation4], %s1305_s11  ;;  %s1352_s28 = int_to_ptr.vmem [resolvable:$true] %s817_s28 }
  0x3e   : > { %950 = vmatpush3.msra.mxu1 %v909_v4  ;;  %947 = vmatmul.mubr.msk.f32.vlgmr.msra.gmra.mrb[0].mxu0 %vm208_vm1, %v206_v3  ;;  %s1082_s7 = scalar_lea.vmem %s1352_s28, 128  ;;  %p1410_p9 = scmp.ne.s32.totalorder %s1406_s25, 0 }
  0x3f   : > { %954 = vmatprep.subr.mxu0 %v1169_v0  ;;  %952 = vmatmul.mubr.msk.f32.vlgmr.msra.gmra.mrb[0].mxu1 %vm208_vm1, %v206_v3  ;;  %p1083_p8 = scmp.ne.s32.totalorder %s1352_s28, %s1082_s7  ;;  %s1172_s15 = smov [#allocation5]  }
  0x40   : > { %955 = vmatpush3.msra.mxu0 %v911_v5  ;;  %959 = vmatprep.subr.mxu1 %v1169_v0  ;;  %s1086_s18 = sshll.u32 %s1172_s15, 4  ;;  %s1087_s18 = int_to_ptr.vmem [resolvable:$false] %s1086_s18 }
  0x41   : > { %956 = vmatprep.mubr.msk.f32.mxu0 %vm1170_vm0, %v1169_v0  ;;  %960 = vmatpush3.msra.mxu1 %v913_v6  ;;  %p1084_p11 = pnand %p1083_p8, %p1410_p9  ;;  %s1088_s19 = scalar_lea.vmem %s1087_s18, 256 }
  0x42   : > { %964 = vmatprep.subr.mxu0 %v1169_v0  ;;  %957 = vmatmul.mubr.msk.f32.vlgmr.msra.gmra.mrb[2].mxu0 %vm208_vm1, %v206_v3  ;;  %p1089_p6 = scmp.lt.s32.totalorder %s1352_s28, %s1087_s18  ;;  %p1090_p13 = scmp.lt.s32.totalorder %s1088_s19, %s1082_s7 }
  0x43   : > { %961 = vmatprep.mubr.msk.f32.mxu1 %vm1170_vm0, %v1169_v0  ;;  %965 = vmatpush3.msra.mxu0 %v915_v7  ;;  %p1085_p0 = pneg %p1084_p11 }
  0x44   : > { %962 = vmatmul.mubr.msk.f32.vlgmr.msra.gmra.mrb[2].mxu1 %vm208_vm1, %v206_v3  ;;  %969 = vmatprep.subr.mxu1 %v1169_v0  ;;  %p1091_p2 = por %p1090_p13, %p1089_p6 }
  0x45   : > { %966 = vmatprep.mubr.msk.f32.mxu0 %vm1170_vm0, %v1169_v0  ;;  %970 = vmatpush3.msra.mxu1 %v917_v8 }
  0x46   : > { %974 = vmatprep.subr.mxu0 %v1169_v0  ;;  %967 = vmatmul.mubr.msk.f32.vlgmr.msra.gmra.mrb[4].mxu0 %vm208_vm1, %v206_v3  ;;  %p1092_p5 = pnand %p1091_p2, %p1085_p0 }
  0x47   : > { %971 = vmatprep.mubr.msk.f32.mxu1 %vm1170_vm0, %v1169_v0  ;;  %975 = vmatpush3.msra.mxu0 %v919_v9 }
  0x48   : > { %972 = vmatmul.mubr.msk.f32.vlgmr.msra.gmra.mrb[4].mxu1 %vm208_vm1, %v206_v3  ;;  %979 = vmatprep.subr.mxu1 %v1169_v0 }
  0x49   : > { %976 = vmatprep.mubr.msk.f32.mxu0 %vm1170_vm0, %v1169_v0  ;;  %980 = vmatpush3.msra.mxu1 %v921_v10 }
  0x4a   : > { %981 = vmatprep.mubr.msk.f32.mxu1 %vm1170_vm0, %v1169_v0  ;;  %977 = vmatmul.mubr.msk.f32.vlgmr.msra.gmra.mrb[6].mxu0 %vm208_vm1, %v206_v3 }
  0x4b   : > { %796 = vperm.xlu0 %1051, %v793_v11  }
  0x4c   : > { %982 = vmatmul.mubr.msk.f32.vlgmr.msra.gmra.mrb[6].mxu1 %vm208_vm1, %v206_v3 }
  0xca   : > { %v797_v34 = vpop.permute.xlu0 %796 }
 0x111   : > { %v278_v12 = vpop.f32.mrb[0].mxu0 }
 0x112   : > { %v948_v13 = vpop.f32.mrb[1].mxu0  ;;  %v350_v14 = vpop.f32.mrb[0].mxu1 }
 0x113   : > { %v354_v15 = vmax.f32 %v278_v12, %v350_v14  ;;  %v953_v16 = vpop.f32.mrb[1].mxu1 }
 0x115   : > { %v423_v17 = vpop.f32.mrb[2].mxu0 }
 0x116   : > { %v427_v18 = vmax.f32 %v354_v15, %v423_v17  ;;  %v958_v19 = vpop.f32.mrb[3].mxu0 }
 0x117   : > { %v496_v20 = vpop.f32.mrb[2].mxu1 }
 0x118   : > { %v963_v21 = vpop.f32.mrb[3].mxu1  ;;  %v500_v22 = vmax.f32 %v427_v18, %v496_v20 }
 0x119   : > { %v569_v23 = vpop.f32.mrb[4].mxu0 }
 0x11a   : > { %v573_v24 = vmax.f32 %v500_v22, %v569_v23  ;;  %v968_v25 = vpop.f32.mrb[5].mxu0 }
 0x11b   : > { %v642_v26 = vpop.f32.mrb[4].mxu1 }
 0x11c   : > { %v973_v27 = vpop.f32.mrb[5].mxu1  ;;  %v646_v28 = vmax.f32 %v573_v24, %v642_v26 }
 0x11d   : > { %v715_v29 = vpop.f32.mrb[6].mxu0 }
 0x11e   : > { %v719_v30 = vmax.f32 %v646_v28, %v715_v29  ;;  %v978_v31 = vpop.f32.mrb[7].mxu0 }
 0x11f   : > { %v788_v32 = vpop.f32.mrb[6].mxu1 }
 0x120   : > { %v983_v33 = vpop.f32.mrb[7].mxu1  ;;  %v792_v35 = vmax.f32 %v719_v30, %v788_v32 }
 0x122   : > { %v799_v36 = vadd.f32 %v797_v34, %v792_v35 }
 0x124   : > { %v800_v37 = vmax.f32 %v799_v36, 0.0 }
 0x126   : > { %801 = vst [vmem:[%s205_s23] sm:$0xff] %v800_v37 }
 0x127   : > { %1095 = shalt.err (!%p1092_p5)
}
 0x128   : > { %s1096_s11 = scalar_lea.hbm %s1350_s4, 128  ;;  %s1100_s24 = scalar_lea.hbm %s1402_s3, 256 }
 0x129   : > { %p1097_p4 = scmp.ne.s32.totalorder %s1350_s4, %s1096_s11  ;;  %p1101_p12 = scmp.lt.u32.totalorder %s1350_s4, %s1402_s3 }
 0x12a   : > { %p1102_p1 = scmp.lt.u32.totalorder %s1100_s24, %s1096_s11  ;;  %p1104_p8 = scmp.lt.u32.totalorder %s1096_s11, %s1350_s4 }
 0x12b   : > { %p1098_p7 = pnand %p1097_p4, %p1410_p9 }
 0x12c   : > { %p1103_p3 = por %p1102_p1, %p1101_p12 }
 0x12d   : > { %p1099_p10 = pneg %p1098_p7 }
 0x12e   : > { %p1105_p11 = por %p1104_p8, %p1103_p3 }
 0x130   : > { %p1106_p0 = pnand %p1105_p11, %p1099_p10 }
 0x132   : > { %1109 = shalt.err (!%p1106_p0)
}
 0x133   : > { %986 = dma.vmem_to_hbm [thread:$0]  (%p1410_p9), %s1352_s28, 128, %s1350_s4, %s803_s5  }
 0x134 PF: > { %s829_s10 = sand.u32 1, %s1144_s12   ;;  %p1411_p6 = scmp.ne.s32.totalorder %s1407_s27, 0 }
 0x135   : > { %p1412_p13 = scmp.ge.s32.totalorder %s1164_s17, 2  ;;  %s830_s22 = scalar_lea.sflag [#allocation4], %s829_s10 }
 0x137   : > { %p993_p2 = pnand %p1412_p13, %p1411_p6 }
 0x139   : > { %1139 = dma.done.wait (!%p993_p2), %s830_s22, 128  }
 0x13a   : > { %1141 = vsyncadd (!%p993_p2), %s830_s22, 4294967168  ;;  %s19_s17 = sadd.s32 1, %s1164_s17   ;;  %s1413_s12 = smov %s1148_s13 }
 0x13b   : > { %p16_p5 = scmp.ge.s32.totalorder %s19_s17, 4   ;;  %s1414_s13 = smov %s1152_s14 }
 0x13c   : > { %s1415_s14 = smov %s1249_s26  ;;  %s1416_s15 = smov %s1160_s16 }
 0x13d   : > { %s1417_s16 = smov %s1419_s20  ;;  %18 = sbr.rel (!%p16_p5) target bundleno = 6 (0x6), region = 84 }
 0x144   :  { %835 = vsyncpa [#allocation3], 1 }
 0x145   :  { %837 = vsyncpa [#allocation3 + $0x1], 1 }
 0x146   :  { %838 = vsyncpa [#allocation4], 1 }
 0x147   :  { %840 = vsyncpa [#allocation4 + $0x1], 1 }

</bundles_post_ra>
